<compile_context>
chip_gen: v5e
topology: v5e:2x2
jax: 0.10.0
libtpu: 0.0.40
codegen_flags: <defaults>
</compile_context>

<pallas_src>
import jax
import jax.numpy as jnp
from jax.experimental import pallas as pl
from jax.experimental.pallas import tpu as pltpu


# ---------------------------------------------------------------------------
# helpers
# ---------------------------------------------------------------------------
def _round_up(x, m):
    return (x + m - 1) // m * m


def _vmem_limit_bytes():
    """Generation-aware scoped-VMEM limit (~100 MiB on v5e/v6e, ~48 MiB on v7x)."""
    try:
        cap = int(pltpu.get_tpu_info().vmem_capacity_bytes)
        return int(max(16 << 20, min(cap - (16 << 20), 100 << 20)))
    except Exception:
        return 32 << 20   # safe on every generation; per-step tiles are ~1-2 MiB


# ---------------------------------------------------------------------------
# Pallas kernels
# ---------------------------------------------------------------------------
def _vx_reduce_kernel(v_ref, x_ref, p_ref):
    """p[c] += V[:, tile] @ x[tile, :]    (row-tile reduction, per core slice c)."""
    @pl.when(pl.program_id(1) == 0)
    def _():
        p_ref[...] = jnp.zeros_like(p_ref)

    p_ref[...] += jnp.dot(v_ref[...], x_ref[...],
                          preferred_element_type=jnp.float32)[None]


def _hidden_reduce_kernel(u_ref, z_ref, v_ref, p_ref):
    """p[c] += V[:, tile] @ relu(U[tile, :] @ z_prev)   (row-tile reduction)."""
    @pl.when(pl.program_id(1) == 0)
    def _():
        p_ref[...] = jnp.zeros_like(p_ref)

    h = jnp.dot(u_ref[...], z_ref[...], preferred_element_type=jnp.float32)
    h = jnp.maximum(h, 0.0).astype(jnp.bfloat16)          # relu of previous layer
    p_ref[...] += jnp.dot(v_ref[...], h,
                          preferred_element_type=jnp.float32)[None]


def _expand_kernel(u_ref, z_ref, o_ref):
    """o[tile] = U[tile, :] @ z_last     (last layer: no activation)."""
    o_ref[...] = jnp.dot(u_ref[...], z_ref[...],
                         preferred_element_type=jnp.float32).astype(o_ref.dtype)


# ---------------------------------------------------------------------------
# pallas_call wrappers
# ---------------------------------------------------------------------------
def _vx_reduce(v_p, x_p, *, tm, n_split, vmem_limit):
    k_pad, n_pad = v_p.shape
    f_in = x_p.shape[1]
    gps = (n_pad // tm) // n_split          # grid steps per parallel slice
    flops = 2 * k_pad * n_pad * f_in
    bytes_acc = 2 * (v_p.size + x_p.size) + 4 * n_split * k_pad * f_in
    return pl.pallas_call(
        _vx_reduce_kernel,
        out_shape=jax.ShapeDtypeStruct((n_split, k_pad, f_in), jnp.float32),
        grid=(n_split, gps),
        in_specs=[
            pl.BlockSpec((k_pad, tm), lambda c, i: (0, c * gps + i)),   # V tile
            pl.BlockSpec((tm, f_in), lambda c, i: (c * gps + i, 0)),    # x tile
        ],
        out_specs=pl.BlockSpec((1, k_pad, f_in), lambda c, i: (c, 0, 0)),
        compiler_params=pltpu.CompilerParams(
            dimension_semantics=("parallel", "arbitrary"),
            vmem_limit_bytes=vmem_limit),
        cost_estimate=pl.CostEstimate(flops=int(flops), transcendentals=0,
                                      bytes_accessed=int(bytes_acc)),
    )(v_p, x_p)


def _hidden_reduce(u_p, z_s, v_p, *, tm, n_split, vmem_limit):
    n_pad, k_pad = u_p.shape
    f = z_s.shape[1]
    gps = (n_pad // tm) // n_split
    flops = 4 * n_pad * k_pad * f
    bytes_acc = 2 * (u_p.size + v_p.size + z_s.size) + 4 * n_split * k_pad * f
    return pl.pallas_call(
        _hidden_reduce_kernel,
        out_shape=jax.ShapeDtypeStruct((n_split, k_pad, f), jnp.float32),
        grid=(n_split, gps),
        in_specs=[
            pl.BlockSpec((tm, k_pad), lambda c, i: (c * gps + i, 0)),   # U tile
            pl.BlockSpec((k_pad, f), lambda c, i: (0, 0)),              # s*z_prev
            pl.BlockSpec((k_pad, tm), lambda c, i: (0, c * gps + i)),   # V tile
        ],
        out_specs=pl.BlockSpec((1, k_pad, f), lambda c, i: (c, 0, 0)),
        compiler_params=pltpu.CompilerParams(
            dimension_semantics=("parallel", "arbitrary"),
            vmem_limit_bytes=vmem_limit),
        cost_estimate=pl.CostEstimate(flops=int(flops), transcendentals=0,
                                      bytes_accessed=int(bytes_acc)),
    )(u_p, z_s, v_p)


def _expand(u_p, z_s, *, tm, out_dtype, vmem_limit):
    n_pad, k_pad = u_p.shape
    f = z_s.shape[1]
    flops = 2 * n_pad * k_pad * f
    bytes_acc = 2 * (u_p.size + z_s.size) + jnp.dtype(out_dtype).itemsize * n_pad * f
    return pl.pallas_call(
        _expand_kernel,
        out_shape=jax.ShapeDtypeStruct((n_pad, f), out_dtype),
        grid=(n_pad // tm,),
        in_specs=[
            pl.BlockSpec((tm, k_pad), lambda i: (i, 0)),       # U tile
            pl.BlockSpec((k_pad, f), lambda i: (0, 0)),        # s*z_last
        ],
        out_specs=pl.BlockSpec((tm, f), lambda i: (i, 0)),
        compiler_params=pltpu.CompilerParams(
            dimension_semantics=("parallel",),                 # independent row tiles
            vmem_limit_bytes=vmem_limit),
        cost_estimate=pl.CostEstimate(flops=int(flops), transcendentals=0,
                                      bytes_accessed=int(bytes_acc)),
    )(u_p, z_s)


# ---------------------------------------------------------------------------
# Model wrapper
# ---------------------------------------------------------------------------
def init_gcnsvd_params(key, in_features, hidden_features, out_features):
    """nn.Linear-style uniform(-1/sqrt(fan_in), 1/sqrt(fan_in)) init."""
    if isinstance(hidden_features, int):
        hidden_features = [hidden_features]
    dims = [in_features] + list(hidden_features) + [out_features]
    params = []
    for i in range(len(dims) - 1):
        key, kw, kb = jax.random.split(key, 3)
        bound = 1.0 / jnp.sqrt(jnp.float32(dims[i]))
        w = jax.random.uniform(kw, (dims[i], dims[i + 1]),
                               minval=-bound, maxval=bound, dtype=jnp.float32)
        b = jax.random.uniform(kb, (dims[i + 1],),
                               minval=-bound, maxval=bound, dtype=jnp.float32)
        params.append((w, b))
    return params


def gcnsvd_forward(x, adj, params, k, *, tm_max=1024, out_dtype=jnp.float32):
    """GCNSVD forward. adj is dense binary [N, N]; x is [N, f_in]."""
    n = adj.shape[0]
    f_in = x.shape[1]
    n_layers = len(params)
    dims = [f_in] + [w.shape[1] for (w, _) in params]

    # truncatedSVD(adj, k): the factorization is plain-JAX numerical glue; the
    # rank-k *application* is fused into the Pallas GCN layers.
    u, s, vh = jnp.linalg.svd(adj.astype(jnp.float32), full_matrices=False)
    u, s, vh = u[:, :k], s[:k], vh[:k, :]
    # utils.adj_preprocess with no adj_norm_func: format conversion only.

    # --- tiling / padding ----------------------------------------------------
    k_pad = _round_up(k, 128)
    tm = min(tm_max, _round_up(n, 128))      # large row tile (sweep 512-2048)
    n_pad = _round_up(n, tm)
    gm = n_pad // tm
    n_split = 2 if (gm >= 2 and gm % 2 == 0) else 1   # v7x: split over both TCs
    f_out_pad = _round_up(dims[-1], 128)     # lane-dense big output only
    vmem_limit = _vmem_limit_bytes()

    # bf16 MXU operands (f32 accumulation); W / b / s / glue stay float32.
    u_p = jnp.zeros((n_pad, k_pad), jnp.bfloat16).at[:n, :k].set(u.astype(jnp.bfloat16))
    v_p = jnp.zeros((k_pad, n_pad), jnp.bfloat16).at[:k, :n].set(vh.astype(jnp.bfloat16))
    x_p = jnp.zeros((n_pad, f_in), jnp.bfloat16).at[:n].set(x.astype(jnp.bfloat16))

    s_col = jnp.zeros((k_pad, 1), jnp.float32).at[:k, 0].set(s)
    r_col = jnp.zeros((k_pad, 1), jnp.float32).at[:k, 0].set(vh.sum(axis=1))  # V @ 1_n

    # --- layer 0:  z0 = (V @ x) @ W0 + (V 1_n) b0  ---------------------------
    p0 = _vx_reduce(v_p, x_p, tm=tm, n_split=n_split,
                    vmem_limit=vmem_limit).sum(axis=0)          # (k_pad, f_in)
    w0, b0 = params[0]
    z = p0 @ w0 + r_col * b0[None, :]                           # (k_pad, dims[1]) f32

    # --- hidden layers:  z_i = (V @ relu(U @ (s*z))) @ W_i + (V 1_n) b_i -----
    for i in range(1, n_layers):
        z_s = (s_col * z).astype(jnp.bfloat16)                  # (k_pad, dims[i])
        pi = _hidden_reduce(u_p, z_s, v_p, tm=tm, n_split=n_split,
                            vmem_limit=vmem_limit).sum(axis=0)  # (k_pad, dims[i])
        wi, bi = params[i]
        z = pi @ wi + r_col * bi[None, :]                       # (k_pad, dims[i+1])

    # --- last layer aggregation:  out = U @ (s * z)  (no activation) ---------
    z_last = jnp.zeros((k_pad, f_out_pad), jnp.float32).at[:, :dims[-1]].set(s_col * z)
    out_p = _expand(u_p, z_last.astype(jnp.bfloat16), tm=tm,
                    out_dtype=out_dtype, vmem_limit=vmem_limit)
    return out_p[:n, :dims[-1]]


# ---------------------------------------------------------------------------
if __name__ == "__main__":
    key = jax.random.PRNGKey(0)

    # Small synthetic graph: N nodes, binary adjacency, node features [N, F_in].
    N = 64
    in_features = 16
    hidden_features = 32
    out_features = 8
    k = 8  # truncated-SVD rank (module default is 50; scaled to small graph)

    key, k_adj, k_x, k_params = jax.random.split(key, 4)
    adj = (jax.random.uniform(k_adj, (N, N)) < 0.1).astype(jnp.float32)
    adj = jnp.maximum(adj, jnp.eye(N, dtype=jnp.float32))  # no empty rows
    x = jax.random.normal(k_x, (N, in_features), dtype=jnp.float32)

    params = init_gcnsvd_params(k_params, in_features, hidden_features,
                                out_features)

    out = gcnsvd_forward(x, adj, params, k)
    out = jax.block_until_ready(out)
    assert out.shape == (N, out_features)
    assert bool(jnp.all(jnp.isfinite(out)))

    # Pure-JAX f32 reference (same truncated SVD); loose bf16 tolerance.
    u, s, vh = jnp.linalg.svd(adj, full_matrices=False)
    adj_lr = (u[:, :k] * s[:k]) @ vh[:k, :]
    h = x
    for i, (w, b) in enumerate(params):
        h = adj_lr @ (h @ w + b)
        if i < len(params) - 1:
            h = jnp.maximum(h, 0.0)
    err = float(jnp.max(jnp.abs(out - h)))
    tol = 0.1 * float(jnp.max(jnp.abs(h))) + 1e-3
    assert err < tol, f"mismatch vs reference: max abs err {err} (tol {tol})"

    print("KERNEL_OK")
</pallas_src>

<mosaic_0001>
module attributes {stable_mosaic.version = 11 : i64} {
  func.func @_vx_reduce_kernel(%arg0: i32, %arg1: i32, %arg2: memref<128x128xbf16, #tpu.memory_space<vmem>>, %arg3: memref<128x16xbf16, #tpu.memory_space<vmem>>, %arg4: memref<1x128x16xf32, #tpu.memory_space<vmem>>) attributes {dimension_semantics = [#tpu.dimension_semantics<parallel>, #tpu.dimension_semantics<arbitrary>], iteration_bounds = array<i64: 1, 1>, scalar_prefetch = 0 : i64, scratch_operands = 0 : i64, tpu.core_type = #tpu.core_type<tc>, window_params = [{transform_indices = @transform_0, window_bounds = array<i64: 128, 128>}, {transform_indices = @transform_1, window_bounds = array<i64: 128, 16>}, {transform_indices = @transform_2, window_bounds = array<i64: 1, 128, 16>}]} {
    %c0_i32 = arith.constant 0 : i32
    %0 = arith.cmpi eq, %arg1, %c0_i32 : i32
    %1 = arith.extui %0 : i1 to i32
    %c0_i32_0 = arith.constant 0 : i32
    %2 = arith.cmpi ne, %1, %c0_i32_0 : i32
    scf.if %2 {
      %cst_10 = arith.constant 0.000000e+00 : f32
      %10 = vector.broadcast %cst_10 : f32 to vector<1x128x16xf32>
      %c0_11 = arith.constant 0 : index
      %c0_12 = arith.constant 0 : index
      %c0_13 = arith.constant 0 : index
      %11 = vector.load %arg4[%c0_11, %c0_12, %c0_13] : memref<1x128x16xf32, #tpu.memory_space<vmem>>, vector<1x128x16xf32>
      tpu.vector_store %arg4[%c0_11, %c0_12, %c0_13], %10 {strides = array<i32>} : memref<1x128x16xf32, #tpu.memory_space<vmem>>, vector<1x128x16xf32>,
    } else {
    }
    %c0 = arith.constant 0 : index
    %c0_1 = arith.constant 0 : index
    %c0_2 = arith.constant 0 : index
    %3 = vector.load %arg4[%c0, %c0_1, %c0_2] : memref<1x128x16xf32, #tpu.memory_space<vmem>>, vector<1x128x16xf32>
    %c0_3 = arith.constant 0 : index
    %c0_4 = arith.constant 0 : index
    %4 = vector.load %arg2[%c0_3, %c0_4] : memref<128x128xbf16, #tpu.memory_space<vmem>>, vector<128x128xbf16>
    %c0_5 = arith.constant 0 : index
    %c0_6 = arith.constant 0 : index
    %5 = vector.load %arg3[%c0_5, %c0_6] : memref<128x16xbf16, #tpu.memory_space<vmem>>, vector<128x16xbf16>
    %cst = arith.constant dense<0.000000e+00> : vector<128x16xf32>
    %6 = tpu.matmul %4, %5, %cst {dimension_numbers = #tpu.dot_dimension_numbers<[1], [0], [0], [1], [0, 0, 1, 1], [], []>} : vector<128x128xbf16>, vector<128x16xbf16>, vector<128x16xf32> -> vector<128x16xf32>
    %7 = vector.shape_cast %6 : vector<128x16xf32> to vector<1x128x16xf32>
    %8 = arith.addf %3, %7 : vector<1x128x16xf32>
    %c0_7 = arith.constant 0 : index
    %c0_8 = arith.constant 0 : index
    %c0_9 = arith.constant 0 : index
    %9 = vector.load %arg4[%c0_7, %c0_8, %c0_9] : memref<1x128x16xf32, #tpu.memory_space<vmem>>, vector<1x128x16xf32>
    tpu.vector_store %arg4[%c0_7, %c0_8, %c0_9], %8 {strides = array<i32>} : memref<1x128x16xf32, #tpu.memory_space<vmem>>, vector<1x128x16xf32>,
    return
  }
  func.func @transform_0(%arg0: i32, %arg1: i32) -> (i32, i32) {
    %c1_i32 = arith.constant 1 : i32
    %0 = arith.muli %arg0, %c1_i32 : i32
    %1 = arith.addi %0, %arg1 : i32
    %c0_i32 = arith.constant 0 : i32
    %c0_i32_0 = arith.constant 0 : i32
    return %c0_i32, %1 : i32, i32
  }
  func.func @transform_1(%arg0: i32, %arg1: i32) -> (i32, i32) {
    %c1_i32 = arith.constant 1 : i32
    %0 = arith.muli %arg0, %c1_i32 : i32
    %1 = arith.addi %0, %arg1 : i32
    %c0_i32 = arith.constant 0 : i32
    %c0_i32_0 = arith.constant 0 : i32
    return %1, %c0_i32 : i32, i32
  }
  func.func @transform_2(%arg0: i32, %arg1: i32) -> (i32, i32, i32) {
    %c0_i32 = arith.constant 0 : i32
    %c0_i32_0 = arith.constant 0 : i32
    %c0_i32_1 = arith.constant 0 : i32
    return %arg0, %c0_i32, %c0_i32_0 : i32, i32, i32
  }
}

</mosaic_0001>

<bundles_post_ra>
// kernel: tpu_custom_call.1
= control target key start
LH: loop header
LB: loop body
LE: loop exit
PB: predicated region body
PF: predicated region fallthrough
CT: control target
= control target key end

     0   :  { %vm54_vm0 = vcmask 130048   ;;  %v418_v6 = vmov 0.0   ;;  %s658_s1 = inlined_call_operand.vmem [shape: bf16[128,16], index: 1, kind: input, shape index: {}]   ;;  %s659_s2 = inlined_call_operand.vmem [shape: f32[1,128,16], index: 2, kind: output, shape index: {}]   ;;  %s660_s0 = inlined_call_operand.vmem [shape: bf16[128,128], index: 0, kind: input, shape index: {}]  }
   0x1   :  { %v392_v0 = vld [vmem:[%s658_s1 + $0x38] sm:$0xff]  ;;  %v391_v1 = vld [vmem:[%s658_s1 + $0x30] sm:$0xff]  ;;  %v390_v2 = vld [vmem:[%s658_s1 + $0x28] sm:$0xff]  ;;  %55 = vst.msk [vmem:[%s659_s2] sm:$0xff] %vm54_vm0, %v418_v6 }
   0x2   :  { %215 = vmatpush.bf16.msra.mxu0 %v392_v0  ;;  %393 = vmatpush.bf16.msra.mxu1 %v392_v0  ;;  %v389_v3 = vld [vmem:[%s658_s1 + $0x20] sm:$0xff]  ;;  %v388_v4 = vld [vmem:[%s658_s1 + $0x18] sm:$0xff]  ;;  %v387_v5 = vld [vmem:[%s658_s1 + $0x10] sm:$0xff]  ;;  %56 = vst.msk [vmem:[%s659_s2 + $0x8] sm:$0xff] %vm54_vm0, %v418_v6 }
   0x3   :  { %394 = vmatpush.bf16.msra.mxu2 %v392_v0  ;;  %395 = vmatpush.bf16.msra.mxu3 %v392_v0  ;;  %57 = vst.msk [vmem:[%s659_s2 + $0x10] sm:$0xff] %vm54_vm0, %v418_v6  ;;  %v386_v7 = vld [vmem:[%s658_s1 + $0x8] sm:$0xff]  ;;  %v385_v8 = vld [vmem:[%s658_s1] sm:$0xff]  ;;  %v379_v10 = vld [vmem:[%s660_s0 + $0x10] sm:$0xff] }
   0x4   :  { %58 = vst.msk [vmem:[%s659_s2 + $0x18] sm:$0xff] %vm54_vm0, %v418_v6  ;;  %v377_v9 = vld [vmem:[%s660_s0] sm:$0xff]  ;;  %v383_v12 = vld [vmem:[%s660_s0 + $0x30] sm:$0xff]  ;;  %v378_v13 = vld [vmem:[%s660_s0 + $0x8] sm:$0xff] }
   0x5   :  { %59 = vst.msk [vmem:[%s659_s2 + $0x20] sm:$0xff] %vm54_vm0, %v418_v6  ;;  %v381_v11 = vld [vmem:[%s660_s0 + $0x20] sm:$0xff]  ;;  %v380_v14 = vld [vmem:[%s660_s0 + $0x18] sm:$0xff]  ;;  %v382_v15 = vld [vmem:[%s660_s0 + $0x28] sm:$0xff] }
   0x6   :  { %216 = vmatpush.bf16.msra.mxu0 %v391_v1  ;;  %396 = vmatpush.bf16.msra.mxu1 %v391_v1  ;;  %60 = vst.msk [vmem:[%s659_s2 + $0x28] sm:$0xff] %vm54_vm0, %v418_v6  ;;  %v384_v16 = vld [vmem:[%s660_s0 + $0x38] sm:$0xff] }
   0x7   :  { %397 = vmatpush.bf16.msra.mxu2 %v391_v1  ;;  %398 = vmatpush.bf16.msra.mxu3 %v391_v1  ;;  %61 = vst.msk [vmem:[%s659_s2 + $0x30] sm:$0xff] %vm54_vm0, %v418_v6 }
   0x8   :  { %62 = vst.msk [vmem:[%s659_s2 + $0x38] sm:$0xff] %vm54_vm0, %v418_v6  ;;  %v71_v17 = vld [vmem:[%s659_s2] sm:$0xff] }
   0x9   :  { %63 = vst.msk [vmem:[%s659_s2 + $0x40] sm:$0xff] %vm54_vm0, %v418_v6  ;;  %v72_v25 = vld [vmem:[%s659_s2 + $0x8] sm:$0xff] }
   0xa   :  { %217 = vmatpush.bf16.msra.mxu0 %v390_v2  ;;  %399 = vmatpush.bf16.msra.mxu1 %v390_v2  ;;  %64 = vst.msk [vmem:[%s659_s2 + $0x48] sm:$0xff] %vm54_vm0, %v418_v6  ;;  %v73_v37 = vld [vmem:[%s659_s2 + $0x10] sm:$0xff] }
   0xb   :  { %400 = vmatpush.bf16.msra.mxu2 %v390_v2  ;;  %401 = vmatpush.bf16.msra.mxu3 %v390_v2  ;;  %65 = vst.msk [vmem:[%s659_s2 + $0x50] sm:$0xff] %vm54_vm0, %v418_v6  ;;  %v74_v49 = vld [vmem:[%s659_s2 + $0x18] sm:$0xff] }
   0xc   :  { %66 = vst.msk [vmem:[%s659_s2 + $0x58] sm:$0xff] %vm54_vm0, %v418_v6  ;;  %v75_v18 = vld [vmem:[%s659_s2 + $0x20] sm:$0xff] }
   0xd   :  { %67 = vst.msk [vmem:[%s659_s2 + $0x60] sm:$0xff] %vm54_vm0, %v418_v6  ;;  %v76_v26 = vld [vmem:[%s659_s2 + $0x28] sm:$0xff] }
   0xe   :  { %218 = vmatpush.bf16.msra.mxu0 %v389_v3  ;;  %402 = vmatpush.bf16.msra.mxu1 %v389_v3  ;;  %68 = vst.msk [vmem:[%s659_s2 + $0x68] sm:$0xff] %vm54_vm0, %v418_v6  ;;  %v77_v38 = vld [vmem:[%s659_s2 + $0x30] sm:$0xff] }
   0xf   :  { %403 = vmatpush.bf16.msra.mxu2 %v389_v3  ;;  %404 = vmatpush.bf16.msra.mxu3 %v389_v3  ;;  %69 = vst.msk [vmem:[%s659_s2 + $0x70] sm:$0xff] %vm54_vm0, %v418_v6  ;;  %v78_v50 = vld [vmem:[%s659_s2 + $0x38] sm:$0xff] }
  0x10   :  { %70 = vst.msk [vmem:[%s659_s2 + $0x78] sm:$0xff] %vm54_vm0, %v418_v6  ;;  %v79_v23 = vld [vmem:[%s659_s2 + $0x40] sm:$0xff] }
  0x11   :  { %v80_v35 = vld [vmem:[%s659_s2 + $0x48] sm:$0xff] }
  0x12   :  { %219 = vmatpush.bf16.msra.mxu0 %v388_v4  ;;  %405 = vmatpush.bf16.msra.mxu1 %v388_v4  ;;  %v81_v47 = vld [vmem:[%s659_s2 + $0x50] sm:$0xff] }
  0x13   :  { %406 = vmatpush.bf16.msra.mxu2 %v388_v4  ;;  %407 = vmatpush.bf16.msra.mxu3 %v388_v4  ;;  %v82_v59 = vld [vmem:[%s659_s2 + $0x58] sm:$0xff] }
  0x14   :  { %v83_v24 = vld [vmem:[%s659_s2 + $0x60] sm:$0xff] }
  0x15   :  { %v84_v36 = vld [vmem:[%s659_s2 + $0x68] sm:$0xff] }
  0x16   :  { %220 = vmatpush.bf16.msra.mxu0 %v387_v5  ;;  %408 = vmatpush.bf16.msra.mxu1 %v387_v5  ;;  %v85_v48 = vld [vmem:[%s659_s2 + $0x70] sm:$0xff] }
  0x17   :  { %409 = vmatpush.bf16.msra.mxu2 %v387_v5  ;;  %410 = vmatpush.bf16.msra.mxu3 %v387_v5  ;;  %v86_v60 = vld [vmem:[%s659_s2 + $0x78] sm:$0xff] }
  0x1a   :  { %221 = vmatpush.bf16.msra.mxu0 %v386_v7  ;;  %411 = vmatpush.bf16.msra.mxu1 %v386_v7 }
  0x1b   :  { %412 = vmatpush.bf16.msra.mxu2 %v386_v7  ;;  %413 = vmatpush.bf16.msra.mxu3 %v386_v7 }
  0x1e   :  { %222 = vmatpush.bf16.msra.mxu0 %v385_v8  ;;  %414 = vmatpush.bf16.msra.mxu1 %v385_v8 }
  0x1f   :  { %415 = vmatpush.bf16.msra.mxu2 %v385_v8  ;;  %416 = vmatpush.bf16.msra.mxu3 %v385_v8 }
  0x21   :  { %223 = vmatmul.bf16.vlgmr.msra.gmra.mxu0 %v377_v9  ;;  %233 = vmatmul.bf16.vlgmr.msra.gmra.mxu1 %v379_v10 }
  0x22   :  { %243 = vmatmul.bf16.vlgmr.msra.gmra.mxu2 %v381_v11  ;;  %253 = vmatmul.bf16.vlgmr.msra.gmra.mxu3 %v383_v12 }
  0x31   :  { %228 = vmatmul.bf16.gmra.mxu0 %v378_v13  ;;  %238 = vmatmul.bf16.gmra.mxu1 %v380_v14 }
  0x32   :  { %248 = vmatmul.bf16.gmra.mxu2 %v382_v15  ;;  %258 = vmatmul.bf16.gmra.mxu3 %v384_v16 }
  0x9e   :  { %v224_v19 = vpop.f32.mrf.mxu0  ;;  %v234_v20 = vpop.f32.mrf.mxu1 }
  0x9f   :  { %v264_v21 = vadd.f32 %v224_v19, %v71_v17  ;;  %v268_v22 = vadd.f32 %v234_v20, %v75_v18 }
  0xa1   :  { %281 = vst.msk [vmem:[%s659_s2] sm:$0xff] %vm54_vm0, %v264_v21 }
  0xa2   :  { %285 = vst.msk [vmem:[%s659_s2 + $0x20] sm:$0xff] %vm54_vm0, %v268_v22 }
  0xa5   :  { %v244_v27 = vpop.f32.mrf.mxu2  ;;  %v254_v28 = vpop.f32.mrf.mxu3 }
  0xa6   :  { %v272_v29 = vadd.f32 %v244_v27, %v79_v23  ;;  %v276_v30 = vadd.f32 %v254_v28, %v83_v24  ;;  %v226_v31 = vpop.f32.mrf.mxu0  ;;  %v236_v32 = vpop.f32.mrf.mxu1 }
  0xa7   :  { %v265_v33 = vadd.f32 %v226_v31, %v72_v25  ;;  %v269_v34 = vadd.f32 %v236_v32, %v76_v26 }
  0xa8   :  { %289 = vst.msk [vmem:[%s659_s2 + $0x40] sm:$0xff] %vm54_vm0, %v272_v29 }
  0xa9   :  { %293 = vst.msk [vmem:[%s659_s2 + $0x60] sm:$0xff] %vm54_vm0, %v276_v30 }
  0xaa   :  { %282 = vst.msk [vmem:[%s659_s2 + $0x8] sm:$0xff] %vm54_vm0, %v265_v33 }
  0xab   :  { %286 = vst.msk [vmem:[%s659_s2 + $0x28] sm:$0xff] %vm54_vm0, %v269_v34 }
  0xad   :  { %v246_v39 = vpop.f32.mrf.mxu2  ;;  %v256_v40 = vpop.f32.mrf.mxu3 }
  0xae   :  { %v273_v41 = vadd.f32 %v246_v39, %v80_v35  ;;  %v277_v42 = vadd.f32 %v256_v40, %v84_v36  ;;  %v229_v43 = vpop.f32.mrf.mxu0  ;;  %v239_v44 = vpop.f32.mrf.mxu1 }
  0xaf   :  { %v266_v45 = vadd.f32 %v229_v43, %v73_v37  ;;  %v270_v46 = vadd.f32 %v239_v44, %v77_v38 }
  0xb0   :  { %290 = vst.msk [vmem:[%s659_s2 + $0x48] sm:$0xff] %vm54_vm0, %v273_v41 }
  0xb1   :  { %294 = vst.msk [vmem:[%s659_s2 + $0x68] sm:$0xff] %vm54_vm0, %v277_v42 }
  0xb2   :  { %283 = vst.msk [vmem:[%s659_s2 + $0x10] sm:$0xff] %vm54_vm0, %v266_v45 }
  0xb3   :  { %287 = vst.msk [vmem:[%s659_s2 + $0x30] sm:$0xff] %vm54_vm0, %v270_v46 }
  0xb5   :  { %v249_v51 = vpop.f32.mrf.mxu2  ;;  %v259_v52 = vpop.f32.mrf.mxu3 }
  0xb6   :  { %v274_v53 = vadd.f32 %v249_v51, %v81_v47  ;;  %v278_v54 = vadd.f32 %v259_v52, %v85_v48  ;;  %v231_v55 = vpop.f32.mrf.mxu0  ;;  %v241_v56 = vpop.f32.mrf.mxu1 }
  0xb7   :  { %v267_v57 = vadd.f32 %v231_v55, %v74_v49  ;;  %v271_v58 = vadd.f32 %v241_v56, %v78_v50 }
  0xb8   :  { %291 = vst.msk [vmem:[%s659_s2 + $0x50] sm:$0xff] %vm54_vm0, %v274_v53 }
  0xb9   :  { %295 = vst.msk [vmem:[%s659_s2 + $0x70] sm:$0xff] %vm54_vm0, %v278_v54 }
  0xba   :  { %284 = vst.msk [vmem:[%s659_s2 + $0x18] sm:$0xff] %vm54_vm0, %v267_v57 }
  0xbb   :  { %288 = vst.msk [vmem:[%s659_s2 + $0x38] sm:$0xff] %vm54_vm0, %v271_v58 }
  0xbd   :  { %v251_v61 = vpop.f32.mrf.mxu2  ;;  %v261_v62 = vpop.f32.mrf.mxu3 }
  0xbe   :  { %v275_v63 = vadd.f32 %v251_v61, %v82_v59  ;;  %v279_v0 = vadd.f32 %v261_v62, %v86_v60 }
  0xc0   :  { %292 = vst.msk [vmem:[%s659_s2 + $0x58] sm:$0xff] %vm54_vm0, %v275_v63 }
  0xc1   :  { %296 = vst.msk [vmem:[%s659_s2 + $0x78] sm:$0xff] %vm54_vm0, %v279_v0 }

</bundles_post_ra>
